<compile_context>
chip_gen: v5e
topology: v5e:2x2
jax: 0.10.0
libtpu: 0.0.40
codegen_flags: <defaults>
</compile_context>

<pallas_src>
import functools

import jax
import jax.numpy as jnp
from jax.experimental import pallas as pl
from jax.experimental.pallas import tpu as pltpu

PAD_VALUE = 1000000000.0  # matches F.pad(..., value=1e9) in the reference


def _erosion_kernel(x_ref, out_ref, *, m, h, w):
    # x_ref / out_ref: (c_blk, h*w) flattened channel blocks in VMEM.
    x = x_ref[...]
    dtype = x.dtype
    hw = h * w
    pad = jnp.asarray(PAD_VALUE, dtype=dtype)
    neg = jnp.asarray(-jnp.inf, dtype=dtype)

    # Lane-only index rows (1, hw): tiny VPU cost, no full-block int temporaries.
    flat_row = jax.lax.broadcasted_iota(jnp.int32, (1, hw), 1)  # flat = i*w + j
    col_row = flat_row % w                                      # column index j

    # ---- vertical pass: min over rows i-m .. i+m ----------------------------
    v = x
    for s in range(1, m + 1):
        # Float mask rows: PAD on lanes whose rolled value wrapped across the
        # image boundary, -inf elsewhere -> max() reproduces constant-pad
        # semantics (assumes inputs <= 1e9, same assumption as the reference).
        up_mask = jnp.where(flat_row < s * w, pad, neg)          # (1, hw)
        dn_mask = jnp.where(flat_row >= hw - s * w, pad, neg)    # (1, hw)
        # neighbor (i-s, j): rotate right by s*w; neighbor (i+s, j): left.
        up = jnp.maximum(pltpu.roll(x, shift=s * w, axis=1), up_mask)
        dn = jnp.maximum(pltpu.roll(x, shift=hw - s * w, axis=1), dn_mask)
        v = jnp.minimum(v, jnp.minimum(up, dn))

    # ---- horizontal pass: min over cols j-m .. j+m on the row-eroded result -
    out = v
    for s in range(1, m + 1):
        lt_mask = jnp.where(col_row < s, pad, neg)               # (1, hw)
        rt_mask = jnp.where(col_row >= w - s, pad, neg)          # (1, hw)
        lt = jnp.maximum(pltpu.roll(v, shift=s, axis=1), lt_mask)
        rt = jnp.maximum(pltpu.roll(v, shift=hw - s, axis=1), rt_mask)
        out = jnp.minimum(out, jnp.minimum(lt, rt))

    out_ref[...] = out


def _vmem_plan():
    """Per-generation (vmem_limit_bytes, target block bytes)."""
    try:
        cap = int(pltpu.get_tpu_info().vmem_capacity_bytes)
    except Exception:  # pragma: no cover - conservative fallback
        cap = 64 * 1024 * 1024
    if cap >= 128 * 1024 * 1024:          # v5e / v6e
        vmem_limit = 64 * 1024 * 1024
        desired = 8 * 1024 * 1024
    else:                                  # v7x (64 MiB per TC)
        vmem_limit = 48 * 1024 * 1024
        desired = 4 * 1024 * 1024
    # Budget ~10 block-sized live buffers: 4 pipelined in/out + roll-chain
    # intermediates inside the kernel.
    target = min(desired, vmem_limit // 10)
    return vmem_limit, target, cap


def erosion2d(x, m=1):
    """Pallas TPU implementation of Erosion2d.forward (NCHW)."""
    assert x.ndim == 4
    assert jnp.issubdtype(x.dtype, jnp.floating), (
        "erosion2d expects a floating dtype (constant pad value is 1e9)")
    b, c, h, w = x.shape
    hw = h * w
    itemsize = jnp.dtype(x.dtype).itemsize
    slab_bytes = hw * itemsize  # one channel

    vmem_limit, target_bytes, vmem_cap = _vmem_plan()

    # ---- channel block sizing ------------------------------------------------
    max_ch = max(1, target_bytes // slab_bytes)
    if c <= max_ch:
        c_blk = c                       # full channel extent: always layout-legal
    elif max_ch >= 8:
        c_blk = (max_ch // 8) * 8       # (8, 128) sublane rule
    else:
        # Single channel slab already ~target-sized; the sublane rule forces an
        # 8-channel block unless c_blk == c.  Raise the limit to fit it rather
        # than OOM silently.  (See TODO(synk) above for the spatial-halo path.)
        c_blk = min(8, c)
        needed = 10 * c_blk * slab_bytes
        vmem_limit = min(max(vmem_limit, needed), (3 * vmem_cap) // 4)

    # Guarantee >= 2 grid steps so both v7x TensorCores get work.
    if b * pl.cdiv(c, c_blk) < 2 and c_blk >= 16:
        c_blk = ((c_blk // 2) // 8) * 8

    grid = (b, pl.cdiv(c, c_blk))

    # Free reshape (merge of trailing dims): lane-dense minor dim of size H*W.
    x_flat = x.reshape(b, c, hw)

    kernel = functools.partial(_erosion_kernel, m=m, h=h, w=w)

    cost = pl.CostEstimate(
        flops=8 * m * b * c * hw,                    # 2 separable passes
        transcendentals=0,
        bytes_accessed=2 * b * c * hw * itemsize,    # one read + one write
    )

    out_flat = pl.pallas_call(
        kernel,
        out_shape=jax.ShapeDtypeStruct((b, c, hw), x.dtype),
        grid_spec=pltpu.PrefetchScalarGridSpec(
            num_scalar_prefetch=0,
            grid=grid,
            in_specs=[
                pl.BlockSpec(
                    (pl.Squeezed(), c_blk, hw),
                    lambda bi, ci: (bi, ci, 0),
                )
            ],
            out_specs=pl.BlockSpec(
                (pl.Squeezed(), c_blk, hw),
                lambda bi, ci: (bi, ci, 0),
            ),
        ),
        compiler_params=pltpu.CompilerParams(
            dimension_semantics=("parallel", "parallel"),
            vmem_limit_bytes=int(vmem_limit),
        ),
        cost_estimate=cost,
    )(x_flat)

    return out_flat.reshape(b, c, h, w)


def erosion2d_ref(x, m=1):
    """Pure-JAX reference mirroring the PyTorch semantics (pad 1e9 + window min)."""
    b, c, h, w = x.shape
    x_pad = jnp.pad(
        x, ((0, 0), (0, 0), (m, m), (m, m)),
        mode="constant", constant_values=PAD_VALUE,
    )
    k = 2 * m + 1
    acc = None
    for di in range(k):
        for dj in range(k):
            win = x_pad[:, :, di:di + h, dj:dj + w]
            acc = win if acc is None else jnp.minimum(acc, win)
    return acc


if __name__ == "__main__":
    key = jax.random.PRNGKey(0)
    b, c, h, w = 2, 4, 16, 16
    x = jax.random.normal(key, (b, c, h, w), dtype=jnp.float32)

    out = erosion2d(x, m=1)
    out = jax.block_until_ready(out)

    ref = erosion2d_ref(x, m=1)
    assert out.shape == (b, c, h, w)
    assert jnp.allclose(out, ref), "Pallas erosion does not match reference"

    print("KERNEL_OK")
</pallas_src>

<mosaic_0001>
module attributes {stable_mosaic.version = 11 : i64} {
  func.func @_erosion_kernel(%arg0: i32, %arg1: i32, %arg2: memref<1x4x256xf32, #tpu.memory_space<vmem>>, %arg3: memref<1x4x256xf32, #tpu.memory_space<vmem>>) attributes {dimension_semantics = [#tpu.dimension_semantics<parallel>, #tpu.dimension_semantics<parallel>], iteration_bounds = array<i64: 2, 1>, scalar_prefetch = 0 : i64, scratch_operands = 0 : i64, tpu.core_type = #tpu.core_type<tc>, window_params = [{transform_indices = @transform_0, window_bounds = array<i64: 1, 4, 256>}, {transform_indices = @transform_1, window_bounds = array<i64: 1, 4, 256>}]} {
    %c0 = arith.constant 0 : index
    %c0_0 = arith.constant 0 : index
    %c0_1 = arith.constant 0 : index
    %0 = vector.load %arg2[%c0, %c0_0, %c0_1] : memref<1x4x256xf32, #tpu.memory_space<vmem>>, vector<1x4x256xf32>
    %1 = vector.shape_cast %0 : vector<1x4x256xf32> to vector<4x256xf32>
    %2 = tpu.iota {dimensions = array<i32: 1>} : vector<1x256xi32>
    %c16_i32 = arith.constant 16 : i32
    %c0_i32 = arith.constant 0 : i32
    %3 = arith.cmpi eq, %c16_i32, %c0_i32 : i32
    %c1_i32 = arith.constant 1 : i32
    %4 = arith.select %3, %c1_i32, %c16_i32 : i32
    %5 = vector.broadcast %4 : i32 to vector<1x256xi32>
    %6 = arith.remsi %2, %5 : vector<1x256xi32>
    %c0_i32_2 = arith.constant 0 : i32
    %7 = vector.broadcast %c0_i32_2 : i32 to vector<1x256xi32>
    %8 = arith.cmpi ne, %6, %7 : vector<1x256xi32>
    %c0_i32_3 = arith.constant 0 : i32
    %9 = vector.broadcast %c0_i32_3 : i32 to vector<1x256xi32>
    %10 = arith.cmpi slt, %6, %9 : vector<1x256xi32>
    %c0_i32_4 = arith.constant 0 : i32
    %11 = arith.cmpi slt, %4, %c0_i32_4 : i32
    %12 = vector.broadcast %11 : i1 to vector<1x256xi1>
    %13 = vector.broadcast %12 : vector<1x256xi1> to vector<1x256xi1>
    %14 = arith.xori %10, %13 : vector<1x256xi1>
    %15 = arith.andi %14, %8 : vector<1x256xi1>
    %16 = vector.broadcast %4 : i32 to vector<1x256xi32>
    %17 = arith.addi %6, %16 : vector<1x256xi32>
    %18 = arith.select %15, %17, %6 : vector<1x256xi1>, vector<1x256xi32>
    %c16_i32_5 = arith.constant 16 : i32
    %19 = vector.broadcast %c16_i32_5 : i32 to vector<1x256xi32>
    %20 = arith.cmpi slt, %2, %19 : vector<1x256xi32>
    %cst = arith.constant 1.000000e+09 : f32
    %cst_6 = arith.constant 0xFF800000 : f32
    %21 = vector.broadcast %cst : f32 to vector<1x256xf32>
    %22 = vector.broadcast %cst_6 : f32 to vector<1x256xf32>
    %23 = arith.select %20, %21, %22 : vector<1x256xi1>, vector<1x256xf32>
    %c240_i32 = arith.constant 240 : i32
    %24 = vector.broadcast %c240_i32 : i32 to vector<1x256xi32>
    %25 = arith.cmpi sge, %2, %24 : vector<1x256xi32>
    %cst_7 = arith.constant 1.000000e+09 : f32
    %cst_8 = arith.constant 0xFF800000 : f32
    %26 = vector.broadcast %cst_7 : f32 to vector<1x256xf32>
    %27 = vector.broadcast %cst_8 : f32 to vector<1x256xf32>
    %28 = arith.select %25, %26, %27 : vector<1x256xi1>, vector<1x256xf32>
    %c16_i32_9 = arith.constant 16 : i32
    %29 = tpu.dynamic_rotate %1 by %c16_i32_9 dim 1 : vector<4x256xf32>, i32 -> vector<4x256xf32>
    %30 = vector.broadcast %23 : vector<1x256xf32> to vector<4x256xf32>
    %31 = arith.maximumf %29, %30 : vector<4x256xf32>
    %c240_i32_10 = arith.constant 240 : i32
    %32 = tpu.dynamic_rotate %1 by %c240_i32_10 dim 1 : vector<4x256xf32>, i32 -> vector<4x256xf32>
    %33 = vector.broadcast %28 : vector<1x256xf32> to vector<4x256xf32>
    %34 = arith.maximumf %32, %33 : vector<4x256xf32>
    %35 = arith.minimumf %31, %34 : vector<4x256xf32>
    %36 = arith.minimumf %1, %35 : vector<4x256xf32>
    %c1_i32_11 = arith.constant 1 : i32
    %37 = vector.broadcast %c1_i32_11 : i32 to vector<1x256xi32>
    %38 = arith.cmpi slt, %18, %37 : vector<1x256xi32>
    %cst_12 = arith.constant 1.000000e+09 : f32
    %cst_13 = arith.constant 0xFF800000 : f32
    %39 = vector.broadcast %cst_12 : f32 to vector<1x256xf32>
    %40 = vector.broadcast %cst_13 : f32 to vector<1x256xf32>
    %41 = arith.select %38, %39, %40 : vector<1x256xi1>, vector<1x256xf32>
    %c15_i32 = arith.constant 15 : i32
    %42 = vector.broadcast %c15_i32 : i32 to vector<1x256xi32>
    %43 = arith.cmpi sge, %18, %42 : vector<1x256xi32>
    %cst_14 = arith.constant 1.000000e+09 : f32
    %cst_15 = arith.constant 0xFF800000 : f32
    %44 = vector.broadcast %cst_14 : f32 to vector<1x256xf32>
    %45 = vector.broadcast %cst_15 : f32 to vector<1x256xf32>
    %46 = arith.select %43, %44, %45 : vector<1x256xi1>, vector<1x256xf32>
    %c1_i32_16 = arith.constant 1 : i32
    %47 = tpu.dynamic_rotate %36 by %c1_i32_16 dim 1 : vector<4x256xf32>, i32 -> vector<4x256xf32>
    %48 = vector.broadcast %41 : vector<1x256xf32> to vector<4x256xf32>
    %49 = arith.maximumf %47, %48 : vector<4x256xf32>
    %c255_i32 = arith.constant 255 : i32
    %50 = tpu.dynamic_rotate %36 by %c255_i32 dim 1 : vector<4x256xf32>, i32 -> vector<4x256xf32>
    %51 = vector.broadcast %46 : vector<1x256xf32> to vector<4x256xf32>
    %52 = arith.maximumf %50, %51 : vector<4x256xf32>
    %53 = arith.minimumf %49, %52 : vector<4x256xf32>
    %54 = arith.minimumf %36, %53 : vector<4x256xf32>
    %c0_17 = arith.constant 0 : index
    %c0_18 = arith.constant 0 : index
    %c0_19 = arith.constant 0 : index
    %55 = vector.load %arg3[%c0_17, %c0_18, %c0_19] : memref<1x4x256xf32, #tpu.memory_space<vmem>>, vector<1x4x256xf32>
    %56 = vector.shape_cast %55 : vector<1x4x256xf32> to vector<4x256xf32>
    %57 = vector.shape_cast %54 : vector<4x256xf32> to vector<1x4x256xf32>
    tpu.vector_store %arg3[%c0_17, %c0_18, %c0_19], %57 {strides = array<i32>} : memref<1x4x256xf32, #tpu.memory_space<vmem>>, vector<1x4x256xf32>,
    return
  }
  func.func @transform_0(%arg0: i32, %arg1: i32) -> (i32, i32, i32) {
    %c0_i32 = arith.constant 0 : i32
    %c0_i32_0 = arith.constant 0 : i32
    return %arg0, %arg1, %c0_i32 : i32, i32, i32
  }
  func.func @transform_1(%arg0: i32, %arg1: i32) -> (i32, i32, i32) {
    %c0_i32 = arith.constant 0 : i32
    %c0_i32_0 = arith.constant 0 : i32
    return %arg0, %arg1, %c0_i32 : i32, i32, i32
  }
}

</mosaic_0001>

<bundles_post_ra>
// kernel: tpu_custom_call.1
= control target key start
LH: loop header
LB: loop body
LE: loop exit
PB: predicated region body
PF: predicated region fallthrough
CT: control target
= control target key end

     0   :  { %6 = vsyncpa [#allocation3], 0  ;;  %s714_s0 = inlined_call_operand.hbm [shape: f32[2,4,256], index: 0, kind: input, shape index: {}]   ;;  %s715_s1 = inlined_call_operand.hbm [shape: f32[2,4,256], index: 1, kind: output, shape index: {}]  }
   0x1   :  { %8 = vsyncpa [#allocation3 + $0x1], 0 }
   0x2   :  { %9 = vsyncpa [#allocation4], 0 }
   0x3   :  { %11 = vsyncpa [#allocation4 + $0x1], 0  ;;  %s588_s6 = smov 0   ;;  %s590_s7 = smov 0  }
   0x4   :  { %s592_s8 = smov 0   ;;  %s594_s9 = smov 0  }
   0x5   :  { %s596_s10 = smov 0   ;;  %s598_s11 = smov 0  }
   0x6 LB: > { %s375_s12 = sadd.s32 4294967295, %s571_s11   ;;  %s376_s13 = sadd.s32 4294967294, %s571_s11   ;;  %s571_s11 = sphi %s598_s11, %s17_s11   ;;  %s567_s10 = sphi %s596_s10, %s724_s10   ;;  %s563_s9 = sphi %s594_s9, %s723_s9   ;;  %s559_s8 = sphi %s592_s8, %s722_s8   ;;  %s555_s7 = sphi %s590_s7, %s721_s7   ;;  %s551_s6 = sphi %s588_s6, %s720_s6  }
   0x7   : > { %s29_s14 = sadd.s32 1, %s567_s10  ;;  %s38_s15 = sadd.s32 1, %s559_s8 }
   0x8   : > { %p31_p0 = scmp.ge.s32.totalorder %s29_s14, 2  ;;  %p45_p1 = scmp.ne.s32.totalorder %s559_s8, %s555_s7 }
   0x9   : > { %p46_p2 = scmp.eq.s32.totalorder %s571_s11, 0  ;;  %p51_p3 = scmp.ne.s32.totalorder %s555_s7, %s551_s6 }
   0xa   : > { %s726_s14 = smov (%p31_p0, %s29_s14), 0  ;;  %p52_p5 = scmp.eq.s32.totalorder %s375_s12, 0 }
   0xb   : > { %p629_p4 = por %p46_p2, %p45_p1  ;;  %s33_s17 = ssub.s32 %s567_s10, %s726_s14 }
   0xc   : > { %p77_p6 = scmp.eq.s32.totalorder %s375_s12, 1  ;;  %p36_p7 = scmp.eq.s32.totalorder %s33_s17, 0 }
   0xd   : > { %p635_p8 = por %p52_p5, %p51_p3  ;;  %p83_p10 = scmp.eq.s32.totalorder %s376_s13, 1 }
   0xe   : > { %p639_p9 = por %p77_p6, %p45_p1  ;;  %p378_p12 = scmp.ge.s32.totalorder %s571_s11, 2 }
   0xf   : > { %s644_s20 = scalar_select %p36_p7, %s559_s8, %s38_s15  }
  0x10   : > { %p646_p11 = por %p83_p10, %p51_p3  ;;  %p404_p13 = scmp.lt.s32.totalorder %s571_s11, 2 }
  0x11   : > { %s103_s22 = sand.u32 1, %s559_s8   ;;  %s390_s24 = sshll.u32 %s567_s10, 3 }
  0x12   : > { %s379_s23 = sshll.u32 %s103_s22, 3  ;;  %s114_s27 = scalar_lea.hbm %s714_s0, %s390_s24 }
  0x13   : > { %s107_s28 = scalar_lea.vmem [#allocation2], %s379_s23  ;;  %s116_s30 = sshll.u32 %s114_s27, 4  ;;  %s117_s30 = int_to_ptr.hbm [resolvable:$true] %s116_s30 }
  0x14   : > { %s118_s29 = sshll.u32 %s107_s28, 4  ;;  %p397_p0 = pnand %p404_p13, %p629_p4  ;;  %s119_s29 = int_to_ptr.vmem [resolvable:$true] %s118_s29 }
  0x15   : > { %p382_p1 = scmp.ge.s32.totalorder %s571_s11, 1  ;;  %p123_p2 = scmp.lt.s32.totalorder %s571_s11, 3 }
  0x16   : > { %s104_s2 = scalar_lea.sflag [#allocation3], %s103_s22 }
  0x17   : > { %399 = dma.hbm_to_vmem [thread:$0]  (!%p397_p0), %s117_s30, 128, %s119_s29, %s104_s2  }
  0x18   : > { %p124_p3 = pnand %p382_p1, %p123_p2 }
  0x19   : > { %s662_s3 = sand.u32 (!%p124_p3), 1, %s555_s7  }
  0x1a   : > { %127 = sbr.rel (%p124_p3) target bundleno = 327 (0x147), region = 24  ;;  %s383_s4 = sshll.u32 (!%p124_p3), %s662_s3, 3 }
  0x1b   : > { %s130_s5 = scalar_lea.sflag (!%p124_p3), [#allocation3], %s662_s3  ;;  %s133_s12 = scalar_lea.vmem (!%p124_p3), [#allocation2], %s383_s4 }
  0x1f   : > { %542 = dma.done.wait (%p635_p8), %s130_s5, 128  }
  0x20   : > { %544 = vsyncadd (%p635_p8), %s130_s5, 4294967168  ;;  %v153_v0 = vld [vmem:[%s133_s12] sm:$0xff]  ;;  %s573_s13 = smov 16   ;;  %s574_s15 = smov 112   ;;  %v154_v5 = vlaneseq  ;;  %v575_v11 = vmov -inf   ;;  %vm222_vm3 = vcmask 1043456  }
  0x21   : > { %190 = vst [vmem:[#allocation1] ss:$2 sm:$0xff] %v153_v0  ;;  %s576_s16 = smov 1   ;;  %s577_s17 = smov 127  }
  0x22   : > { %v155_v7 = vand.u32 127, %v154_v5  ;;  %s391_s18 = sshll.u32 %s563_s9, 3  ;;  %s152_s25 = scalar_lea.vmem [#allocation5], %s383_s4 }
  0x23   : > { %s286_s24 = scalar_lea.hbm %s715_s1, %s391_s18  ;;  %s288_s9 = sshll.u32 %s152_s25, 4  ;;  %s289_s9 = int_to_ptr.vmem [resolvable:$true] %s288_s9 }
  0x24   : > { %v156_v9 = vadd.s32 128, %v155_v7  ;;  %vm181_vm1 = vcmp.lt.s32.totalorder %v155_v7, 16  ;;  %vm212_vm2 = vcmp.lt.s32.totalorder %v155_v7, 112  ;;  %v161_v32 = vand.u32 15, %v155_v7  ;;  %s290_s26 = sshll.u32 %s286_s24, 4  ;;  %s273_s27 = scalar_lea.sflag [#allocation4], %s662_s3  ;;  %s291_s26 = int_to_ptr.hbm [resolvable:$true] %s290_s26 }
  0x25   : > { %v183_v14 = vsel %vm181_vm1, 1e+09, %v575_v11  ;;  %vm244_vm5 = vcmp.lt.s32.totalorder %v155_v7, 1  ;;  %vm258_vm9 = vcmp.lt.s32.totalorder %v155_v7, 127  ;;  %s503_s28 = sshra.s32 %s291_s26, 4  ;;  %s509_s4 = scalar_lea.hbm %s715_s1, 16  ;;  %s504_s28 = int_to_ptr.hbm [resolvable:$true] %s503_s28 }
  0x26   : > { %vm186_vm0 = vcmp.ge.s32.totalorder %v156_v9, 240  ;;  %v168_v31 = vand.u32 15, %v156_v9  ;;  %vm230_vm6 = vcmp.ge.s32.totalorder %v161_v32, 15  ;;  %vm226_vm8 = vcmp.lt.s32.totalorder %v161_v32, 1  ;;  %s505_s29 = scalar_lea.hbm %s504_s28, 8  ;;  %p510_p7 = scmp.lt.s32.totalorder %s504_s28, %s715_s1 }
  0x27   : > { %v188_v12 = vsel %vm186_vm0, 1e+09, %v575_v11  ;;  %v232_v37 = vsel %vm230_vm6, 1e+09, %v575_v11  ;;  %v228_v40 = vsel %vm226_vm8, 1e+09, %v575_v11  ;;  %p506_p4 = scmp.ne.s32.totalorder %s504_s28, %s505_s29  ;;  %p511_p8 = scmp.lt.s32.totalorder %s509_s4, %s505_s29 }
  0x28   : > { %v191_v1 = vld.sshfl [vmem:[#allocation1] sm:$0xff pattern:$0x75316420]  ;;  %v192_v2 = vld.sshfl [vmem:[#allocation1 + $0x8] sm:$0xff pattern:$0x75316420] }
  0x29   : > { %195 = vrot.lane.b32.xlu1 %v191_v1, %s573_s13  ;;  %203 = vst [vmem:[#allocation1] ss:$2 sm:$0xff] %v153_v0  ;;  %vm227_vm4 = vcmp.lt.s32.totalorder %v168_v31, 1  ;;  %vm231_vm7 = vcmp.ge.s32.totalorder %v168_v31, 15  ;;  %p507_p5 = pnand %p506_p4, %p639_p9  ;;  %p512_p10 = por %p511_p8, %p510_p7 }
  0x2a   : > { %v229_v34 = vsel %vm227_vm4, 1e+09, %v575_v11  ;;  %v233_v38 = vsel %vm231_vm7, 1e+09, %v575_v11 }
  0x2b   : > { %p508_p6 = pneg %p507_p5 }
  0x2d   : > { %p513_p13 = pnand %p512_p10, %p508_p6 }
  0x30   : > { %v204_v3 = vld.sshfl [vmem:[#allocation1] sm:$0xff pattern:$0x75316420]  ;;  %v205_v4 = vld.sshfl [vmem:[#allocation1 + $0x8] sm:$0xff pattern:$0x75316420] }
  0x31   : > { %208 = vrot.lane.b32.xlu0 %v204_v3, %s574_s15  ;;  %197 = vrot.lane.b32.xlu1 %v192_v2, %s573_s13 }
  0x39   : > { %210 = vrot.lane.b32.xlu0 %v205_v4, %s574_s15 }
  0x9b   : > { %v196_v6 = vpop.permute.xlu1 %195 }
  0xa3   : > { %v209_v8 = vpop.permute.xlu0 %208  ;;  %v198_v10 = vpop.permute.xlu1 %197 }
  0xa4   : > { %v200_v15 = vsel %vm181_vm1, %v198_v10, %v196_v6  ;;  %v199_v18 = vsel %vm181_vm1, %v196_v6, %v198_v10 }
  0xa5   : > { %v201_v20 = vmax.f32 %v200_v15, %v183_v14 }
  0xab   : > { %v211_v13 = vpop.permute.xlu0 %210 }
  0xac   : > { %v214_v16 = vsel %vm212_vm2, %v211_v13, %v209_v8  ;;  %v213_v19 = vsel %vm212_vm2, %v209_v8, %v211_v13 }
  0xad   : > { %v216_v17 = vmax.f32 %v214_v16, %v188_v12  ;;  %v217_v22 = vmin.f32 %v201_v20, %v213_v19 }
  0xaf   : > { %v218_v21 = vmin.f32 %v199_v18, %v216_v17 }
  0xb1   : > { %v221_v23 = vrot.slane %v218_v21, 4 }
  0xb3   : > { %v223_v24 = vsel %vm222_vm3, %v217_v22, %v221_v23 }
  0xb4   : > { %v225_v25 = vmin.f32 %v153_v0, %v223_v24 }
  0xb6   : > { %235 = vst [vmem:[#allocation1] ss:$2 sm:$0xff] %v225_v25 }
  0xbd   : > { %v236_v26 = vld.sshfl [vmem:[#allocation1] sm:$0xff pattern:$0x75316420]  ;;  %v237_v27 = vld.sshfl [vmem:[#allocation1 + $0x8] sm:$0xff pattern:$0x75316420] }
  0xbe   : > { %240 = vrot.lane.b32.xlu2 %v236_v26, %s576_s16  ;;  %249 = vst [vmem:[#allocation1] ss:$2 sm:$0xff] %v225_v25 }
  0xc5   : > { %v251_v28 = vld.sshfl [vmem:[#allocation1 + $0x8] sm:$0xff pattern:$0x75316420]  ;;  %v250_v29 = vld.sshfl [vmem:[#allocation1] sm:$0xff pattern:$0x75316420] }
  0xc6   : > { %242 = vrot.lane.b32.xlu2 %v237_v27, %s576_s16  ;;  %256 = vrot.lane.b32.xlu1 %v251_v28, %s577_s17 }
  0xc7   : > { %254 = vrot.lane.b32.xlu0 %v250_v29, %s577_s17 }
 0x118   : > { %v241_v30 = vpop.permute.xlu2 %240 }
 0x120   : > { %v243_v33 = vpop.permute.xlu2 %242 }
 0x121   : > { %v245_v35 = vsel %vm244_vm5, %v241_v30, %v243_v33  ;;  %v246_v41 = vsel %vm244_vm5, %v243_v33, %v241_v30 }
 0x122   : > { %v248_v44 = vmax.f32 %v245_v35, %v229_v34  ;;  %v247_v47 = vmax.f32 %v246_v41, %v228_v40 }
 0x138   : > { %v257_v36 = vpop.permute.xlu1 %256 }
 0x139   : > { %v255_v39 = vpop.permute.xlu0 %254 }
 0x13a   : > { %v259_v42 = vsel %vm258_vm9, %v255_v39, %v257_v36  ;;  %v260_v43 = vsel %vm258_vm9, %v257_v36, %v255_v39 }
 0x13b   : > { %v261_v45 = vmax.f32 %v259_v42, %v232_v37  ;;  %v262_v46 = vmax.f32 %v260_v43, %v233_v38 }
 0x13d   : > { %v264_v48 = vmin.f32 %v248_v44, %v262_v46  ;;  %v263_v49 = vmin.f32 %v247_v47, %v261_v45 }
 0x13f   : > { %v267_v50 = vrot.slane %v264_v48, 4 }
 0x141   : > { %v268_v51 = vsel %vm222_vm3, %v263_v49, %v267_v50 }
 0x142   : > { %v270_v52 = vmin.f32 %v225_v25, %v268_v51 }
 0x144   : > { %271 = vst [vmem:[%s152_s25] sm:$0xff] %v270_v52 }
 0x145   : > { %516 = shalt.err (!%p513_p13)
}
 0x146   : > { %394 = dma.vmem_to_hbm [thread:$0]  (%p639_p9), %s289_s9, 128, %s291_s26, %s273_s27  }
 0x147 PF: > { %s302_s3 = sand.u32 1, %s551_s6   ;;  %p401_p0 = pnand %p378_p12, %p646_p11 }
 0x148   : > { %s303_s13 = scalar_lea.sflag [#allocation4], %s302_s3 }
 0x149   : > { %p402_p1 = pneg %p401_p0 }
 0x14b   : > { %546 = dma.done.wait (%p402_p1), %s303_s13, 128  }
 0x14c   : > { %548 = vsyncadd (%p402_p1), %s303_s13, 4294967168  ;;  %s17_s11 = sadd.s32 1, %s571_s11   ;;  %s720_s6 = smov %s555_s7 }
 0x14d   : > { %p14_p2 = scmp.ge.s32.totalorder %s17_s11, 4   ;;  %s721_s7 = smov %s559_s8 }
 0x14e   : > { %s722_s8 = smov %s644_s20  ;;  %s723_s9 = smov %s567_s10 }
 0x14f   : > { %s724_s10 = smov %s726_s14  ;;  %16 = sbr.rel (!%p14_p2) target bundleno = 6 (0x6), region = 69 }
 0x154   :  { %309 = vsyncpa [#allocation3], 1 }
 0x155   :  { %311 = vsyncpa [#allocation3 + $0x1], 1 }
 0x156   :  { %312 = vsyncpa [#allocation4], 1 }
 0x157   :  { %314 = vsyncpa [#allocation4 + $0x1], 1 }

</bundles_post_ra>
